<compile_context>
chip_gen: v7x
topology: tpu7x:2x2x1
jax: 0.10.0
libtpu: 0.0.40
codegen_flags: <defaults>
</compile_context>

<pallas_src>
import functools

import jax
import jax.numpy as jnp
from jax.experimental import pallas as pl
from jax.experimental.pallas import tpu as pltpu


# ---------------------------------------------------------------------------
# Hardware queries (generation aware, with conservative fallbacks).
# ---------------------------------------------------------------------------

def _round_up(a, b):
    return ((a + b - 1) // b) * b


@functools.lru_cache(maxsize=None)
def _vmem_capacity_bytes():
    try:
        info = pltpu.get_tpu_info()
        cap = getattr(info, "vmem_capacity_bytes", None)
        if cap:
            return int(cap)
    except Exception:
        pass
    return 64 << 20  # conservative fallback: v7x per-TensorCore VMEM


@functools.lru_cache(maxsize=None)
def _num_tensorcores():
    try:
        info = pltpu.get_tpu_info()
        for name in ("num_tensorcores", "tensorcores_per_chip",
                     "num_tensor_cores", "num_cores", "cores_per_chip"):
            v = getattr(info, name, None)
            if v:
                return int(v)
    except Exception:
        pass
    return 1  # v5e/v6e (single TC) default; skips the dual-TC grid split


@functools.lru_cache(maxsize=None)
def _probe_lane_roll():
    """Detect pltpu.roll support & direction. Returns (supported, numpy_convention)."""
    try:
        def k(x_ref, o_ref):
            o_ref[...] = pltpu.roll(x_ref[...], 1, axis=1)

        x = jnp.tile(jnp.arange(256, dtype=jnp.float32)[None, :], (8, 1))
        y = jax.block_until_ready(
            pl.pallas_call(k, out_shape=jax.ShapeDtypeStruct((8, 256), jnp.float32))(x))
        v = float(y[0, 1])
        if v == 0.0:     # y[i] == x[i-1]  -> np.roll convention
            return True, True
        if v == 2.0:     # y[i] == x[i+1]  -> opposite convention
            return True, False
        return False, True
    except Exception:
        return False, True


def _divisors(n):
    return [d for d in range(1, n + 1) if n % d == 0]


# ---------------------------------------------------------------------------
# Kernel
# ---------------------------------------------------------------------------

def _make_fcn_kernel(nb, roll_amounts, roll_input):
    """Fused conv (tap reduction) + bias + LeakyReLU(0.2) kernel body.

    w_ref: (taps, C_out, Ck) resident weight — one (C_out, Ck) matrix per tap.
    x_ref: (nb, Ck, TL) input tile; lanes (TL) are flattened spatial positions.
    b_ref: (C_out, 1) f32 bias.
    o_ref: (nb, C_out, TL) output tile (lane-dense stores).
    roll_amounts[t] is the static lane roll realizing tap t's (dh, dw) shift
    over the full flattened H*W extent (0 for the 1x1 / im2col paths).
    """
    def kernel(w_ref, x_ref, b_ref, o_ref):
        bias = b_ref[...]                                   # (C_out, 1) f32
        for b in range(nb):                                 # static unroll
            xb = x_ref[b]                                   # (Ck, TL)
            acc = None
            for t, amt in enumerate(roll_amounts):          # static unroll over taps
                xt = xb
                if amt and roll_input:
                    xt = pltpu.roll(xb, amt, axis=1)
                part = jnp.dot(w_ref[t], xt, preferred_element_type=jnp.float32)
                if amt and not roll_input:
                    part = pltpu.roll(part, amt, axis=1)
                acc = part if acc is None else acc + part
            acc = acc + bias                                # f32 bias add
            o_ref[b] = jnp.maximum(acc, 0.2 * acc).astype(o_ref.dtype)  # LeakyReLU(0.2)
    return kernel


# ---------------------------------------------------------------------------
# Wrapper
# ---------------------------------------------------------------------------

def fcn_block_forward(x, weight, bias, *, compute_dtype=None, out_dtype=None,
                      max_lane_tile=None):
    """FCNBlock forward: Conv2d(stride 1, no padding) + LeakyReLU(0.2).

    x:      (N, C_in, H, W)        NCHW, like PyTorch.
    weight: (C_out, C_in, kh, kw)  Conv2d weight.
    bias:   (C_out,)               Conv2d bias.
    compute_dtype: dtype fed to the MXU (x AND weight are cast to it; pass
        jnp.bfloat16 to halve HBM traffic — accumulate/bias/LeakyReLU stay f32).
    out_dtype: output dtype (default: x.dtype).
    max_lane_tile: test/tuning knob to force a small lane tile.
    Returns (N, C_out, H_out, W_out) with H_out = H-kh+1, W_out = W-kw+1.
    """
    N, C_in, H, W = x.shape
    C_out, C_in_w, kh, kw = weight.shape
    assert C_in_w == C_in, (C_in_w, C_in)
    H_out, W_out = H - kh + 1, W - kw + 1
    assert H_out > 0 and W_out > 0, (H_out, W_out)
    M = H_out * W_out
    S = H * W
    taps = kh * kw

    compute_dtype = jnp.dtype(compute_dtype if compute_dtype is not None else x.dtype)
    out_dtype = jnp.dtype(out_dtype if out_dtype is not None else x.dtype)
    isize = compute_dtype.itemsize
    osize = out_dtype.itemsize
    w_elems = C_out * C_in * taps

    vmem_cap = _vmem_capacity_bytes()
    budget = int(0.70 * vmem_cap)          # byte budget for (double-buffered) tiles
    cores = _num_tensorcores()

    def per_lane_bytes(nb_, ck):
        # double-buffered input + output tiles plus f32 intermediates, per lane
        return nb_ * (2 * ck * isize + 2 * C_out * osize) + 2 * C_out * 4

    # ---- path selection ------------------------------------------------------
    numpy_conv = True
    if kh == 1 and kw == 1:
        mode = "pointwise"
    else:
        roll_ok, numpy_conv = _probe_lane_roll()
        fused_bytes = (per_lane_bytes(1, C_in) + C_in * isize) * S + 2 * w_elems * isize
        mode = "fused" if (roll_ok and fused_bytes <= budget) else "im2col"

    # ---- build operands for the chosen path ----------------------------------
    if mode == "pointwise":
        # NCHW already has spatial last: free reshape, no transpose either way.
        x3d = x.reshape(N, C_in, M).astype(compute_dtype)
        w3 = weight.reshape(1, C_out, C_in).astype(compute_dtype)
        roll_amounts = (0,)
        Ck, Mtot = C_in, M
    elif mode == "fused":
        # Keep the FULL flattened spatial extent (H*W) as lanes; each (dh, dw)
        # tap is a static lane roll inside the kernel, so no im2col slab ever
        # touches HBM.  Lanes past the valid output window hold wrap garbage
        # and are sliced off in the wrapper.
        x3d = x.reshape(N, C_in, S).astype(compute_dtype)
        w3 = jnp.transpose(weight, (2, 3, 0, 1)).reshape(taps, C_out, C_in)
        w3 = w3.astype(compute_dtype)
        shifts = tuple(dh * W + dw for dh in range(kh) for dw in range(kw))
        roll_amounts = tuple(0 if s == 0 else ((S - s) if numpy_conv else s)
                             for s in shifts)
        Ck, Mtot = C_in, S
    else:  # "im2col" fallback (roll unavailable or image too large for full-S tiles)
        # TODO(synk): row-tiled fused path with a (kh-1)-row halo so large images
        # also avoid the im2col HBM round-trip.
        patches = [x[:, :, dh:dh + H_out, dw:dw + W_out]
                   for dh in range(kh) for dw in range(kw)]
        cols = jnp.stack(patches, axis=1)                 # (N, taps, C_in, H_out, W_out)
        x3d = cols.reshape(N, taps * C_in, M).astype(compute_dtype)
        w3 = jnp.transpose(weight, (2, 3, 0, 1)).reshape(taps, C_out, C_in)
        w3 = jnp.transpose(w3, (1, 0, 2)).reshape(1, C_out, taps * C_in)
        w3 = w3.astype(compute_dtype)
        roll_amounts = (0,)
        Ck, Mtot = taps * C_in, M

    b2 = bias.reshape(C_out, 1).astype(jnp.float32)

    # ---- lane-tile (TL) from the VMEM byte budget -----------------------------
    tl_cap = (budget // per_lane_bytes(1, Ck)) // 128 * 128
    tl_cap = max(128, min(tl_cap, 65536))
    if max_lane_tile is not None:
        tl_cap = max(128, (min(int(max_lane_tile), tl_cap) // 128) * 128)
    TL = Mtot if Mtot <= tl_cap else tl_cap
    if mode == "fused":
        TL = Mtot  # the roll trick needs the whole flattened row structure
    # TODO(synk): add a K-tiling grid axis (+ f32 VMEM accumulator scratch) for
    # the pathological case where even a 128-lane tile overflows the budget.

    # ---- batch blocking: small images get >= ~2048 lanes of work per step ----
    nb = 1
    if TL == Mtot and N > 1 and Mtot < 2048 and max_lane_tile is None:
        want = -(-2048 // Mtot)
        divs = _divisors(N)
        nb = next((d for d in divs if d >= want), N)
        while nb > 1 and per_lane_bytes(nb, Ck) * TL + 2 * w_elems * isize > budget:
            nb = max(d for d in divs if d < nb)

    gb = N // nb
    gm = pl.cdiv(Mtot, TL)

    # Dual-TC (v7x): if everything collapsed to one grid step, split the lane
    # axis into an even number of steps so both TensorCores get balanced work.
    if (gb * gm == 1 and cores >= 2 and mode != "fused"
            and Mtot >= 1024 and max_lane_tile is None):
        TL = _round_up(-(-Mtot // 2), 128)
        gm = pl.cdiv(Mtot, TL)

    # ---- VMEM limit: sized from the footprint, capped at 90% of physical -----
    footprint = (per_lane_bytes(nb, Ck) * TL + 2 * w_elems * isize
                 + 2 * C_out * 4 + (1 << 20))
    vmem_limit = int(min(0.90 * vmem_cap, max(32 << 20, 2 * footprint)))

    kernel = _make_fcn_kernel(nb, roll_amounts, roll_input=(C_in <= C_out))

    y3d = pl.pallas_call(
        kernel,
        out_shape=jax.ShapeDtypeStruct((N, C_out, Mtot), out_dtype),
        grid_spec=pltpu.PrefetchScalarGridSpec(
            num_scalar_prefetch=0,
            grid=(gb, gm),
            in_specs=[
                pl.BlockSpec(tuple(w3.shape), lambda i, j: (0, 0, 0)),  # weight (resident)
                pl.BlockSpec((nb, Ck, TL), lambda i, j: (i, 0, j)),     # x tile
                pl.BlockSpec((C_out, 1), lambda i, j: (0, 0)),          # bias (resident)
            ],
            out_specs=pl.BlockSpec((nb, C_out, TL), lambda i, j: (i, 0, j)),
        ),
        compiler_params=pltpu.CompilerParams(
            dimension_semantics=("parallel", "parallel"),
            vmem_limit_bytes=vmem_limit,
        ),
    )(w3, x3d, b2)

    if mode == "fused":
        return y3d.reshape(N, C_out, H, W)[:, :, :H_out, :W_out]
    return y3d.reshape(N, C_out, H_out, W_out)


# ---------------------------------------------------------------------------
# Params / reference
# ---------------------------------------------------------------------------

def init_fcn_params(key, in_channels, out_channels, kernel_size=1,
                    dtype=jnp.float32):
    if isinstance(kernel_size, int):
        kernel_size = (kernel_size, kernel_size)
    kh, kw = kernel_size
    w_key, b_key = jax.random.split(key)
    fan_in = in_channels * kh * kw
    bound = 1.0 / (float(fan_in) ** 0.5)  # PyTorch Conv2d default init range
    weight = jax.random.uniform(
        w_key, (out_channels, in_channels, kh, kw),
        minval=-bound, maxval=bound, dtype=dtype)
    bias = jax.random.uniform(
        b_key, (out_channels,), minval=-bound, maxval=bound, dtype=dtype)
    return weight, bias


def _reference_forward(x, weight, bias):
    """Pure-JAX reference (lax conv) for correctness checking."""
    y = jax.lax.conv_general_dilated(
        x, weight, window_strides=(1, 1), padding="VALID",
        dimension_numbers=("NCHW", "OIHW", "NCHW"))
    y = y + bias.reshape(1, -1, 1, 1)
    return jnp.where(y >= 0, y, 0.2 * y)


if __name__ == "__main__":
    key = jax.random.PRNGKey(0)
    x_key, p_key, p3_key = jax.random.split(key, 3)

    N, C_in, H, W, C_out = 2, 4, 16, 16, 8
    x = jax.random.normal(x_key, (N, C_in, H, W), dtype=jnp.float32)

    # --- 1x1 conv (module default), f32 ---------------------------------------
    w1, b1 = init_fcn_params(p_key, C_in, C_out, 1)
    y = jax.block_until_ready(fcn_block_forward(x, w1, b1))
    y_ref = _reference_forward(x, w1, b1)
    assert y.shape == y_ref.shape, (y.shape, y_ref.shape)
    assert jnp.allclose(y, y_ref, atol=1e-5, rtol=1e-5), float(
        jnp.max(jnp.abs(y - y_ref)))

    # --- 1x1 conv, bf16 compute path (f32 accumulate / epilogue) --------------
    y_bf = jax.block_until_ready(
        fcn_block_forward(x, w1, b1, compute_dtype=jnp.bfloat16))
    assert jnp.allclose(y_bf, y_ref, atol=2e-1, rtol=5e-2), float(
        jnp.max(jnp.abs(y_bf - y_ref)))

    # --- 1x1 conv on 15x15 input with a forced 128-lane tile: exercises the
    #     partial last lane block (M=225) and a multi-step grid ----------------
    x15 = jax.random.normal(x_key, (N, C_in, 15, 15), dtype=jnp.float32)
    y15 = jax.block_until_ready(fcn_block_forward(x15, w1, b1, max_lane_tile=128))
    y15_ref = _reference_forward(x15, w1, b1)
    assert jnp.allclose(y15, y15_ref, atol=1e-5, rtol=1e-5), float(
        jnp.max(jnp.abs(y15 - y15_ref)))

    # --- 3x3 conv: fused tap-reduction path (no im2col HBM slab), M=196 -------
    w3x3, b3x3 = init_fcn_params(p3_key, C_in, C_out, 3)
    y3 = jax.block_until_ready(fcn_block_forward(x, w3x3, b3x3))
    y3_ref = _reference_forward(x, w3x3, b3x3)
    assert y3.shape == y3_ref.shape, (y3.shape, y3_ref.shape)
    assert jnp.allclose(y3, y3_ref, atol=1e-4, rtol=1e-4), float(
        jnp.max(jnp.abs(y3 - y3_ref)))

    print("KERNEL_OK")
</pallas_src>

<mosaic_0001>
module attributes {stable_mosaic.version = 11 : i64} {
  func.func @kernel(%arg0: i32, %arg1: i32, %arg2: memref<1x8x4xf32, #tpu.memory_space<vmem>>, %arg3: memref<2x4x256xf32, #tpu.memory_space<vmem>>, %arg4: memref<8x1xf32, #tpu.memory_space<vmem>>, %arg5: memref<2x8x256xf32, #tpu.memory_space<vmem>>) attributes {dimension_semantics = [#tpu.dimension_semantics<parallel>, #tpu.dimension_semantics<parallel>], iteration_bounds = array<i64: 1, 1>, scalar_prefetch = 0 : i64, scratch_operands = 0 : i64, tpu.core_type = #tpu.core_type<tc>, window_params = [{pipeline_mode = #tpu.pipeline_mode<synchronous>, transform_indices = @transform_0, window_bounds = array<i64: 1, 8, 4>}, {transform_indices = @transform_1, window_bounds = array<i64: 2, 4, 256>}, {pipeline_mode = #tpu.pipeline_mode<synchronous>, transform_indices = @transform_2, window_bounds = array<i64: 8, 1>}, {transform_indices = @transform_3, window_bounds = array<i64: 2, 8, 256>}]} {
    %c0 = arith.constant 0 : index
    %c0_0 = arith.constant 0 : index
    %0 = vector.load %arg4[%c0, %c0_0] : memref<8x1xf32, #tpu.memory_space<vmem>>, vector<8x1xf32>
    %c0_1 = arith.constant 0 : index
    %c0_2 = arith.constant 0 : index
    %c0_3 = arith.constant 0 : index
    %1 = vector.load %arg3[%c0_1, %c0_2, %c0_3] : memref<2x4x256xf32, #tpu.memory_space<vmem>>, vector<1x4x256xf32>
    %2 = vector.shape_cast %1 : vector<1x4x256xf32> to vector<4x256xf32>
    %c0_4 = arith.constant 0 : index
    %c0_5 = arith.constant 0 : index
    %c0_6 = arith.constant 0 : index
    %3 = vector.load %arg2[%c0_4, %c0_5, %c0_6] : memref<1x8x4xf32, #tpu.memory_space<vmem>>, vector<1x8x4xf32>
    %4 = vector.shape_cast %3 : vector<1x8x4xf32> to vector<8x4xf32>
    %cst = arith.constant dense<0.000000e+00> : vector<8x256xf32>
    %5 = tpu.matmul %4, %2, %cst {dimension_numbers = #tpu.dot_dimension_numbers<[1], [0], [0], [1], [0, 0, 1, 1], [], []>} : vector<8x4xf32>, vector<4x256xf32>, vector<8x256xf32> -> vector<8x256xf32>
    %6 = vector.broadcast %0 : vector<8x1xf32> to vector<8x256xf32>
    %7 = arith.addf %5, %6 : vector<8x256xf32>
    %cst_7 = arith.constant 2.000000e-01 : f32
    %8 = vector.broadcast %cst_7 : f32 to vector<8x256xf32>
    %9 = arith.mulf %8, %7 : vector<8x256xf32>
    %10 = arith.maximumf %7, %9 : vector<8x256xf32>
    %c0_8 = arith.constant 0 : index
    %c0_9 = arith.constant 0 : index
    %c0_10 = arith.constant 0 : index
    %11 = vector.load %arg5[%c0_8, %c0_9, %c0_10] : memref<2x8x256xf32, #tpu.memory_space<vmem>>, vector<1x8x256xf32>
    %12 = vector.shape_cast %11 : vector<1x8x256xf32> to vector<8x256xf32>
    %13 = vector.shape_cast %10 : vector<8x256xf32> to vector<1x8x256xf32>
    tpu.vector_store %arg5[%c0_8, %c0_9, %c0_10], %13 {strides = array<i32>} : memref<2x8x256xf32, #tpu.memory_space<vmem>>, vector<1x8x256xf32>,
    %c1 = arith.constant 1 : index
    %c0_11 = arith.constant 0 : index
    %c0_12 = arith.constant 0 : index
    %14 = vector.load %arg3[%c1, %c0_11, %c0_12] : memref<2x4x256xf32, #tpu.memory_space<vmem>>, vector<1x4x256xf32>
    %15 = vector.shape_cast %14 : vector<1x4x256xf32> to vector<4x256xf32>
    %c0_13 = arith.constant 0 : index
    %c0_14 = arith.constant 0 : index
    %c0_15 = arith.constant 0 : index
    %16 = vector.load %arg2[%c0_13, %c0_14, %c0_15] : memref<1x8x4xf32, #tpu.memory_space<vmem>>, vector<1x8x4xf32>
    %17 = vector.shape_cast %16 : vector<1x8x4xf32> to vector<8x4xf32>
    %cst_16 = arith.constant dense<0.000000e+00> : vector<8x256xf32>
    %18 = tpu.matmul %17, %15, %cst_16 {dimension_numbers = #tpu.dot_dimension_numbers<[1], [0], [0], [1], [0, 0, 1, 1], [], []>} : vector<8x4xf32>, vector<4x256xf32>, vector<8x256xf32> -> vector<8x256xf32>
    %19 = vector.broadcast %0 : vector<8x1xf32> to vector<8x256xf32>
    %20 = arith.addf %18, %19 : vector<8x256xf32>
    %cst_17 = arith.constant 2.000000e-01 : f32
    %21 = vector.broadcast %cst_17 : f32 to vector<8x256xf32>
    %22 = arith.mulf %21, %20 : vector<8x256xf32>
    %23 = arith.maximumf %20, %22 : vector<8x256xf32>
    %c1_18 = arith.constant 1 : index
    %c0_19 = arith.constant 0 : index
    %c0_20 = arith.constant 0 : index
    %24 = vector.load %arg5[%c1_18, %c0_19, %c0_20] : memref<2x8x256xf32, #tpu.memory_space<vmem>>, vector<1x8x256xf32>
    %25 = vector.shape_cast %24 : vector<1x8x256xf32> to vector<8x256xf32>
    %26 = vector.shape_cast %23 : vector<8x256xf32> to vector<1x8x256xf32>
    tpu.vector_store %arg5[%c1_18, %c0_19, %c0_20], %26 {strides = array<i32>} : memref<2x8x256xf32, #tpu.memory_space<vmem>>, vector<1x8x256xf32>,
    return
  }
  func.func @transform_0(%arg0: i32, %arg1: i32) -> (i32, i32, i32) {
    %c0_i32 = arith.constant 0 : i32
    %c0_i32_0 = arith.constant 0 : i32
    %c0_i32_1 = arith.constant 0 : i32
    %c0_i32_2 = arith.constant 0 : i32
    return %c0_i32, %c0_i32_0, %c0_i32_1 : i32, i32, i32
  }
  func.func @transform_1(%arg0: i32, %arg1: i32) -> (i32, i32, i32) {
    %c0_i32 = arith.constant 0 : i32
    %c0_i32_0 = arith.constant 0 : i32
    return %arg0, %c0_i32, %arg1 : i32, i32, i32
  }
  func.func @transform_2(%arg0: i32, %arg1: i32) -> (i32, i32) {
    %c0_i32 = arith.constant 0 : i32
    %c0_i32_0 = arith.constant 0 : i32
    %c0_i32_1 = arith.constant 0 : i32
    return %c0_i32, %c0_i32_0 : i32, i32
  }
  func.func @transform_3(%arg0: i32, %arg1: i32) -> (i32, i32, i32) {
    %c0_i32 = arith.constant 0 : i32
    %c0_i32_0 = arith.constant 0 : i32
    return %arg0, %c0_i32, %arg1 : i32, i32, i32
  }
}

</mosaic_0001>

<bundles_post_ra>
// kernel: tpu_custom_call.1
= control target key start
LH: loop header
LB: loop body
LE: loop exit
PB: predicated region body
PF: predicated region fallthrough
CT: control target
= control target key end

     0   :  { %vm29_vm0 = vcmask 1043456   ;;  %v256_v4 = vmov 0.0   ;;  %s309_s0 = inlined_call_operand.vmem [shape: f32[1,8,4], index: 0, kind: input, shape index: {}]   ;;  %s310_s1 = inlined_call_operand.vmem [shape: f32[2,4,256], index: 1, kind: input, shape index: {}]   ;;  %s311_s2 = inlined_call_operand.vmem [shape: f32[8,1], index: 2, kind: input, shape index: {}]   ;;  %s312_s3 = inlined_call_operand.hbm [shape: f32[2,8,256], index: 3, kind: output, shape index: {}]  }
   0x1   :  { %v16_v0 = vld [vmem:[%s310_s1] sm:$0xff]  ;;  %v220_v1 = vld [vmem:[%s310_s1 + $0x8] sm:$0xff]  ;;  %98 = vmatprep.mubr.f32.mxu0 %v256_v4  ;;  %187 = vmatprep.mubr.f32.mxu1 %v256_v4 }
   0x2   :  { %v24_v2 = vcombine.high %v16_v0, %v16_v0  ;;  %v115_v3 = vcombine.high %v220_v1, %v220_v1 }
   0x3   :  { %8 = vsyncpa [#allocation3], 0  ;;  %v17_v5 = vld [vmem:[%s309_s0] sm:$0xff]  ;;  %vm25_vm1 = vcmask 31744   ;;  %v257_v6 = vmov 0   ;;  %s258_s0 = smov [#allocation2]  }
   0x4   :  { %229 = vset.pattern.permute.xlu0 %v257_v6  ;;  %217 = vmatprep.subr.msk.mxu0 %vm29_vm0, %v24_v2  ;;  %v15_v7 = vld [vmem:[%s311_s2] sm:$0xff]  ;;  %s206_s1 = sshll.u32 %s258_s0, 4  ;;  %s207_s1 = int_to_ptr.vmem [resolvable:$true] %s206_s1 }
   0x5   :  { %221 = vmatprep.subr.msk.mxu1 %vm29_vm0, %v115_v3  ;;  %218 = vmatpush1.msk.msra.mxu0 %vm29_vm0, %v16_v0  ;;  %s232_s2 = scalar_lea.vmem %s207_s1, 512  ;;  %p237_p1 = scmp.lt.s32.totalorder %s207_s1, %s207_s1 }
   0x6   :  { %222 = vmatpush1.msk.msra.mxu1 %vm29_vm0, %v220_v1  ;;  %219 = vmatmul.mubr.msk.f32.vlgmr.msra.gmra.mrb[0].mxu0 %vm25_vm1, %v17_v5  ;;  %p233_p0 = scmp.ne.s32.totalorder %s207_s1, %s232_s2  ;;  %p238_p2 = scmp.lt.s32.totalorder %s232_s2, %s232_s2 }
   0x7   :  { %223 = vmatmul.mubr.msk.f32.vlgmr.msra.gmra.mrb[0].mxu1 %vm25_vm1, %v17_v5  ;;  %20 = vperm.xlu0 %229, %v15_v7  }
   0x8   :  { %p239_p3 = por %p238_p2, %p237_p1 }
   0xa   :  { %p240_p4 = pnand %p239_p3, %p233_p0 }
  0x86   :  { %v21_v8 = vpop.permute.xlu0 %20 }
  0xd9   :  { %v100_v9 = vpop.f32.mrb[0].mxu0 }
  0xda   :  { %v189_v10 = vpop.f32.mrb[0].mxu1  ;;  %v101_v11 = vadd.f32 %v100_v9, %v21_v8  ;;  %v102_v13 = vpop.f32.mrb[1].mxu0 }
  0xdb   :  { %v190_v12 = vadd.f32 %v189_v10, %v21_v8  ;;  %v191_v14 = vpop.f32.mrb[1].mxu1  ;;  %v103_v15 = vadd.f32 %v102_v13, %v21_v8 }
  0xdc   :  { %v192_v16 = vadd.f32 %v191_v14, %v21_v8  ;;  %v105_v17 = vmul.f32 0.2, %v101_v11 }
  0xdd   :  { %v194_v18 = vmul.f32 0.2, %v190_v12  ;;  %v106_v19 = vmul.f32 0.2, %v103_v15 }
  0xde   :  { %v195_v20 = vmul.f32 0.2, %v192_v16  ;;  %v107_v21 = vmax.f32 %v101_v11, %v105_v17 }
  0xdf   :  { %v196_v22 = vmax.f32 %v190_v12, %v194_v18  ;;  %v108_v23 = vmax.f32 %v103_v15, %v106_v19 }
  0xe0   :  { %v197_v24 = vmax.f32 %v192_v16, %v195_v20  ;;  %109 = vst [vmem:[#allocation2] sm:$0xff] %v107_v21 }
  0xe1   :  { %199 = vst [vmem:[#allocation2 + $0x10] sm:$0xff] %v196_v22  ;;  %110 = vst [vmem:[#allocation2 + $0x8] sm:$0xff] %v108_v23 }
  0xe2   :  { %200 = vst [vmem:[#allocation2 + $0x18] sm:$0xff] %v197_v24 }
  0xe3   :  { %243 = shalt.err (!%p240_p4)
}
  0xe4   :  { %s244_s22 = scalar_lea.hbm %s312_s3, 512 }
  0xe5   :  { %p245_p5 = scmp.ne.s32.totalorder %s312_s3, %s244_s22  ;;  %p248_p6 = scmp.lt.u32.totalorder %s244_s22, %s312_s3 }
  0xe7   :  { %p250_p7 = pnand %p248_p6, %p245_p5 }
  0xe9   :  { %253 = shalt.err (!%p250_p7)
}
  0xea   :  { %s259_s27 = smov 256   ;;  %s260_s28 = smov 16  }
  0xeb   :  { %212 = dma.vmem_to_hbm [thread:$0]  %s207_s1, 512, %s312_s3, [#allocation3], %s259_s27, %s259_s27, %s260_s28  }
  0xec   :  { %254 = dma.done.wait [#allocation3], 512  }
  0xed   :  { %255 = vsyncadd [#allocation3], 4294966784 }
  0xee   :  { %216 = vsyncpa [#allocation3], 1 }

</bundles_post_ra>
